<compile_context>
chip_gen: v7x
topology: tpu7x:2x2x1
jax: 0.10.0
libtpu: 0.0.40
codegen_flags: <defaults>
</compile_context>

<pallas_src>
import jax
import jax.numpy as jnp
from jax.experimental import pallas as pl
from jax.experimental.pallas import tpu as pltpu

N_STATES = 35
N_ACTIONS = 5
NETWORK_WIDTH = 128
N_OUT_PAD = 128          # lane-dense padded width of fc4 for the in-kernel softmax
N_OUT_STORE = 8          # stored output width (N_ACTIONS padded 5 -> 8)
NEG_SENTINEL = -1e30     # finite "-inf" for padded logits (exp -> 0, no NaN)


def _round_up(x, m):
    return ((x + m - 1) // m) * m


def actor_kernel(x_ref,
                 w1_ref, b1_ref,
                 w2_ref, b2_ref,
                 w3_ref, b3_ref,
                 w4_ref, b4_ref,
                 out_ref):
    # fc1 + relu  (bf16 MXU operands, f32 accumulate / elementwise)
    h = jnp.dot(x_ref[...], w1_ref[...], preferred_element_type=jnp.float32)
    h = jnp.maximum(h + b1_ref[...], 0.0)
    # fc2 + relu
    h = jnp.dot(h.astype(w2_ref.dtype), w2_ref[...],
                preferred_element_type=jnp.float32)
    h = jnp.maximum(h + b2_ref[...], 0.0)
    # fc3 + relu
    h = jnp.dot(h.astype(w3_ref.dtype), w3_ref[...],
                preferred_element_type=jnp.float32)
    h = jnp.maximum(h + b3_ref[...], 0.0)
    # fc4 logits, padded to a full 128-lane tile (pad lanes carry -1e30 bias)
    logits = jnp.dot(h.astype(w4_ref.dtype), w4_ref[...],
                     preferred_element_type=jnp.float32) + b4_ref[...]

    # softmax over the padded row: pad lanes -> exp(-1e30 - m) == 0
    m = jnp.max(logits, axis=1, keepdims=True)
    e = jnp.exp(logits - m)
    denom = jnp.sum(e, axis=1, keepdims=True)
    probs = e / denom            # exact divide: rows sum to 1 (f32 precision)

    # store only the first 8 lanes (5 real actions + 3 zero pad lanes)
    out_ref[...] = probs[:, :N_OUT_STORE].astype(out_ref.dtype)


def prepare_params(params):
    """One-time prep: bf16 weights (MXU), f32 biases, fc4 padded lane-dense.

    Call this once and reuse the result; doing it per forward call would put
    pad/scatter/cast XLA ops on the hot path of every environment step.
    """
    (w1, b1), (w2, b2), (w3, b3), (w4, b4) = params
    w4p = jnp.zeros((NETWORK_WIDTH, N_OUT_PAD), jnp.float32)
    w4p = w4p.at[:, :N_ACTIONS].set(w4)
    b4p = jnp.full((1, N_OUT_PAD), NEG_SENTINEL, jnp.float32)
    b4p = b4p.at[:, :N_ACTIONS].set(b4)
    bf = lambda w: w.astype(jnp.bfloat16)
    return (bf(w1), b1, bf(w2), b2, bf(w3), b3, bf(w4p), b4p)


def actor_forward(x, prepared_params, *, block_b=1024):
    """x: (B, ...) flattened to (B, n_states). Returns (B, n_actions) probs.

    `prepared_params` is the output of prepare_params() (cached by caller).
    """
    B = x.shape[0]
    x2 = x.reshape(B, -1)
    assert x2.shape[1] == N_STATES, f"expected {N_STATES} features, got {x2.shape[1]}"

    # Batch tile: multiple of 16 (bf16 sublane packing).  Cap at ~half the
    # (rounded) batch so the grid has >= 2 steps whenever possible -> both
    # v7x TensorCores get work; don't over-pad tiny batches.
    tb_cap = _round_up(block_b, 16)
    half_b = _round_up(max(_round_up(B, 16) // 2, 16), 16)
    TB = min(tb_cap, half_b)
    B_pad = _round_up(B, TB)
    if B_pad != B:
        x2 = jnp.pad(x2, ((0, B_pad - B), (0, 0)))
    x2 = x2.astype(jnp.bfloat16)

    w1, b1, w2, b2, w3, b3, w4p, b4p = prepared_params

    grid = (B_pad // TB,)
    resident = lambda i: (0, 0)   # weights/biases: same block every step

    flops = 2 * B_pad * (N_STATES * NETWORK_WIDTH
                         + 2 * NETWORK_WIDTH * NETWORK_WIDTH
                         + NETWORK_WIDTH * N_OUT_PAD)
    bytes_accessed = (x2.size * 2                      # bf16 activations in
                      + B_pad * N_OUT_STORE * 4        # narrow f32 probs out
                      + sum(w.size * 2 for w in (w1, w2, w3, w4p))
                      + sum(b.size * 4 for b in (b1, b2, b3, b4p)))
    transcendentals = B_pad * N_OUT_PAD                # exp per padded lane

    out_padded = pl.pallas_call(
        actor_kernel,
        out_shape=jax.ShapeDtypeStruct((B_pad, N_OUT_STORE), jnp.float32),
        grid=grid,
        in_specs=[
            pl.BlockSpec((TB, N_STATES), lambda i: (i, 0)),
            pl.BlockSpec((N_STATES, NETWORK_WIDTH), resident),
            pl.BlockSpec((1, NETWORK_WIDTH), resident),
            pl.BlockSpec((NETWORK_WIDTH, NETWORK_WIDTH), resident),
            pl.BlockSpec((1, NETWORK_WIDTH), resident),
            pl.BlockSpec((NETWORK_WIDTH, NETWORK_WIDTH), resident),
            pl.BlockSpec((1, NETWORK_WIDTH), resident),
            pl.BlockSpec((NETWORK_WIDTH, N_OUT_PAD), resident),
            pl.BlockSpec((1, N_OUT_PAD), resident),
        ],
        out_specs=pl.BlockSpec((TB, N_OUT_STORE), lambda i: (i, 0)),
        compiler_params=pltpu.CompilerParams(
            dimension_semantics=("parallel",)),
        cost_estimate=pl.CostEstimate(
            flops=flops,
            transcendentals=transcendentals,
            bytes_accessed=bytes_accessed),
    )(x2, w1, b1, w2, b2, w3, b3, w4p, b4p)

    # strip batch padding and the (tiny) lane padding of the stored output
    return out_padded[:B, :N_ACTIONS]


def init_params(key):
    """Deterministic synthetic init; weights as (in, out), biases as (1, out)."""
    dims = [(N_STATES, NETWORK_WIDTH),
            (NETWORK_WIDTH, NETWORK_WIDTH),
            (NETWORK_WIDTH, NETWORK_WIDTH),
            (NETWORK_WIDTH, N_ACTIONS)]
    params = []
    for (fan_in, fan_out) in dims:
        key, kw, kb = jax.random.split(key, 3)
        bound = 1.0 / jnp.sqrt(fan_in)  # torch.nn.Linear default init range
        w = jax.random.uniform(kw, (fan_in, fan_out), jnp.float32, -bound, bound)
        b = jax.random.uniform(kb, (1, fan_out), jnp.float32, -bound, bound)
        params.append((w, b))
    return params


def actor_reference(x, params):
    """Pure-JAX f32 reference for correctness check."""
    B = x.shape[0]
    h = x.reshape(B, -1).astype(jnp.float32)
    (w1, b1), (w2, b2), (w3, b3), (w4, b4) = params
    h = jnp.maximum(h @ w1 + b1, 0.0)
    h = jnp.maximum(h @ w2 + b2, 0.0)
    h = jnp.maximum(h @ w3 + b3, 0.0)
    logits = h @ w4 + b4
    return jax.nn.softmax(logits, axis=1)


if __name__ == "__main__":
    key = jax.random.PRNGKey(0)
    key, kx = jax.random.split(key)

    batch = 2
    x = jax.random.normal(kx, (batch, N_STATES), jnp.float32)

    params = init_params(key)
    prepared = prepare_params(params)   # hoisted out of the per-call path

    out = jax.block_until_ready(actor_forward(x, prepared))
    ref = actor_reference(x, params)

    assert out.shape == (batch, N_ACTIONS)
    # exact softmax divide: probabilities sum to 1 to f32 precision
    assert jnp.allclose(jnp.sum(out, axis=1), 1.0, atol=1e-3)
    # bf16 MXU operands: loosen tolerance vs f32 reference
    assert jnp.allclose(out, ref, atol=2e-2, rtol=2e-2)

    print("KERNEL_OK")
</pallas_src>

<mosaic_0001>
module attributes {stable_mosaic.version = 11 : i64} {
  func.func @actor_kernel(%arg0: i32, %arg1: memref<16x35xbf16, #tpu.memory_space<vmem>>, %arg2: memref<35x128xbf16, #tpu.memory_space<vmem>>, %arg3: memref<1x128xf32, #tpu.memory_space<vmem>>, %arg4: memref<128x128xbf16, #tpu.memory_space<vmem>>, %arg5: memref<1x128xf32, #tpu.memory_space<vmem>>, %arg6: memref<128x128xbf16, #tpu.memory_space<vmem>>, %arg7: memref<1x128xf32, #tpu.memory_space<vmem>>, %arg8: memref<128x128xbf16, #tpu.memory_space<vmem>>, %arg9: memref<1x128xf32, #tpu.memory_space<vmem>>, %arg10: memref<16x8xf32, #tpu.memory_space<vmem>>) attributes {dimension_semantics = [#tpu.dimension_semantics<parallel>], iteration_bounds = array<i64: 1>, scalar_prefetch = 0 : i64, scratch_operands = 0 : i64, tpu.core_type = #tpu.core_type<tc>, window_params = [{transform_indices = @transform_0, window_bounds = array<i64: 16, 35>}, {pipeline_mode = #tpu.pipeline_mode<synchronous>, transform_indices = @transform_1, window_bounds = array<i64: 35, 128>}, {pipeline_mode = #tpu.pipeline_mode<synchronous>, transform_indices = @transform_2, window_bounds = array<i64: 1, 128>}, {pipeline_mode = #tpu.pipeline_mode<synchronous>, transform_indices = @transform_3, window_bounds = array<i64: 128, 128>}, {pipeline_mode = #tpu.pipeline_mode<synchronous>, transform_indices = @transform_4, window_bounds = array<i64: 1, 128>}, {pipeline_mode = #tpu.pipeline_mode<synchronous>, transform_indices = @transform_5, window_bounds = array<i64: 128, 128>}, {pipeline_mode = #tpu.pipeline_mode<synchronous>, transform_indices = @transform_6, window_bounds = array<i64: 1, 128>}, {pipeline_mode = #tpu.pipeline_mode<synchronous>, transform_indices = @transform_7, window_bounds = array<i64: 128, 128>}, {pipeline_mode = #tpu.pipeline_mode<synchronous>, transform_indices = @transform_8, window_bounds = array<i64: 1, 128>}, {transform_indices = @transform_9, window_bounds = array<i64: 16, 8>}]} {
    %c0 = arith.constant 0 : index
    %c0_0 = arith.constant 0 : index
    %0 = vector.load %arg1[%c0, %c0_0] : memref<16x35xbf16, #tpu.memory_space<vmem>>, vector<16x35xbf16>
    %c0_1 = arith.constant 0 : index
    %c0_2 = arith.constant 0 : index
    %1 = vector.load %arg2[%c0_1, %c0_2] : memref<35x128xbf16, #tpu.memory_space<vmem>>, vector<35x128xbf16>
    %cst = arith.constant dense<0.000000e+00> : vector<16x128xf32>
    %2 = tpu.matmul %0, %1, %cst {dimension_numbers = #tpu.dot_dimension_numbers<[1], [0], [0], [1], [0, 0, 1, 1], [], []>} : vector<16x35xbf16>, vector<35x128xbf16>, vector<16x128xf32> -> vector<16x128xf32>
    %c0_3 = arith.constant 0 : index
    %c0_4 = arith.constant 0 : index
    %3 = vector.load %arg3[%c0_3, %c0_4] : memref<1x128xf32, #tpu.memory_space<vmem>>, vector<1x128xf32>
    %4 = vector.broadcast %3 : vector<1x128xf32> to vector<16x128xf32>
    %5 = arith.addf %2, %4 : vector<16x128xf32>
    %cst_5 = arith.constant 0.000000e+00 : f32
    %6 = vector.broadcast %cst_5 : f32 to vector<16x128xf32>
    %7 = arith.maximumf %5, %6 : vector<16x128xf32>
    %8 = arith.truncf %7 : vector<16x128xf32> to vector<16x128xbf16>
    %c0_6 = arith.constant 0 : index
    %c0_7 = arith.constant 0 : index
    %9 = vector.load %arg4[%c0_6, %c0_7] : memref<128x128xbf16, #tpu.memory_space<vmem>>, vector<128x128xbf16>
    %cst_8 = arith.constant dense<0.000000e+00> : vector<16x128xf32>
    %10 = tpu.matmul %8, %9, %cst_8 {dimension_numbers = #tpu.dot_dimension_numbers<[1], [0], [0], [1], [0, 0, 1, 1], [], []>} : vector<16x128xbf16>, vector<128x128xbf16>, vector<16x128xf32> -> vector<16x128xf32>
    %c0_9 = arith.constant 0 : index
    %c0_10 = arith.constant 0 : index
    %11 = vector.load %arg5[%c0_9, %c0_10] : memref<1x128xf32, #tpu.memory_space<vmem>>, vector<1x128xf32>
    %12 = vector.broadcast %11 : vector<1x128xf32> to vector<16x128xf32>
    %13 = arith.addf %10, %12 : vector<16x128xf32>
    %cst_11 = arith.constant 0.000000e+00 : f32
    %14 = vector.broadcast %cst_11 : f32 to vector<16x128xf32>
    %15 = arith.maximumf %13, %14 : vector<16x128xf32>
    %16 = arith.truncf %15 : vector<16x128xf32> to vector<16x128xbf16>
    %c0_12 = arith.constant 0 : index
    %c0_13 = arith.constant 0 : index
    %17 = vector.load %arg6[%c0_12, %c0_13] : memref<128x128xbf16, #tpu.memory_space<vmem>>, vector<128x128xbf16>
    %cst_14 = arith.constant dense<0.000000e+00> : vector<16x128xf32>
    %18 = tpu.matmul %16, %17, %cst_14 {dimension_numbers = #tpu.dot_dimension_numbers<[1], [0], [0], [1], [0, 0, 1, 1], [], []>} : vector<16x128xbf16>, vector<128x128xbf16>, vector<16x128xf32> -> vector<16x128xf32>
    %c0_15 = arith.constant 0 : index
    %c0_16 = arith.constant 0 : index
    %19 = vector.load %arg7[%c0_15, %c0_16] : memref<1x128xf32, #tpu.memory_space<vmem>>, vector<1x128xf32>
    %20 = vector.broadcast %19 : vector<1x128xf32> to vector<16x128xf32>
    %21 = arith.addf %18, %20 : vector<16x128xf32>
    %cst_17 = arith.constant 0.000000e+00 : f32
    %22 = vector.broadcast %cst_17 : f32 to vector<16x128xf32>
    %23 = arith.maximumf %21, %22 : vector<16x128xf32>
    %24 = arith.truncf %23 : vector<16x128xf32> to vector<16x128xbf16>
    %c0_18 = arith.constant 0 : index
    %c0_19 = arith.constant 0 : index
    %25 = vector.load %arg8[%c0_18, %c0_19] : memref<128x128xbf16, #tpu.memory_space<vmem>>, vector<128x128xbf16>
    %cst_20 = arith.constant dense<0.000000e+00> : vector<16x128xf32>
    %26 = tpu.matmul %24, %25, %cst_20 {dimension_numbers = #tpu.dot_dimension_numbers<[1], [0], [0], [1], [0, 0, 1, 1], [], []>} : vector<16x128xbf16>, vector<128x128xbf16>, vector<16x128xf32> -> vector<16x128xf32>
    %c0_21 = arith.constant 0 : index
    %c0_22 = arith.constant 0 : index
    %27 = vector.load %arg9[%c0_21, %c0_22] : memref<1x128xf32, #tpu.memory_space<vmem>>, vector<1x128xf32>
    %28 = vector.broadcast %27 : vector<1x128xf32> to vector<16x128xf32>
    %29 = arith.addf %26, %28 : vector<16x128xf32>
    %cst_23 = arith.constant dense<0xFF800000> : vector<16xf32>
    %30 = vector.multi_reduction <maximumf>, %29, %cst_23 [1] : vector<16x128xf32> to vector<16xf32>
    %31 = vector.shape_cast %30 : vector<16xf32> to vector<16x1xf32>
    %32 = vector.broadcast %31 : vector<16x1xf32> to vector<16x128xf32>
    %33 = arith.subf %29, %32 : vector<16x128xf32>
    %34 = math.exp %33 : vector<16x128xf32>
    %cst_24 = arith.constant dense<0.000000e+00> : vector<16xf32>
    %35 = vector.multi_reduction <add>, %34, %cst_24 [1] : vector<16x128xf32> to vector<16xf32>
    %36 = vector.shape_cast %35 : vector<16xf32> to vector<16x1xf32>
    %37 = vector.broadcast %36 : vector<16x1xf32> to vector<16x128xf32>
    %38 = arith.divf %34, %37 : vector<16x128xf32>
    %39 = vector.extract_strided_slice %38 {offsets = [0, 0], sizes = [16, 8], strides = [1, 1]} : vector<16x128xf32> to vector<16x8xf32>
    %c0_25 = arith.constant 0 : index
    %c0_26 = arith.constant 0 : index
    %40 = vector.load %arg10[%c0_25, %c0_26] : memref<16x8xf32, #tpu.memory_space<vmem>>, vector<16x8xf32>
    tpu.vector_store %arg10[%c0_25, %c0_26], %39 {strides = array<i32>} : memref<16x8xf32, #tpu.memory_space<vmem>>, vector<16x8xf32>,
    return
  }
  func.func @transform_0(%arg0: i32) -> (i32, i32) {
    %c0_i32 = arith.constant 0 : i32
    %c0_i32_0 = arith.constant 0 : i32
    return %arg0, %c0_i32 : i32, i32
  }
  func.func @transform_1(%arg0: i32) -> (i32, i32) {
    %c0_i32 = arith.constant 0 : i32
    %c0_i32_0 = arith.constant 0 : i32
    %c0_i32_1 = arith.constant 0 : i32
    return %c0_i32, %c0_i32_0 : i32, i32
  }
  func.func @transform_2(%arg0: i32) -> (i32, i32) {
    %c0_i32 = arith.constant 0 : i32
    %c0_i32_0 = arith.constant 0 : i32
    %c0_i32_1 = arith.constant 0 : i32
    return %c0_i32, %c0_i32_0 : i32, i32
  }
  func.func @transform_3(%arg0: i32) -> (i32, i32) {
    %c0_i32 = arith.constant 0 : i32
    %c0_i32_0 = arith.constant 0 : i32
    %c0_i32_1 = arith.constant 0 : i32
    return %c0_i32, %c0_i32_0 : i32, i32
  }
  func.func @transform_4(%arg0: i32) -> (i32, i32) {
    %c0_i32 = arith.constant 0 : i32
    %c0_i32_0 = arith.constant 0 : i32
    %c0_i32_1 = arith.constant 0 : i32
    return %c0_i32, %c0_i32_0 : i32, i32
  }
  func.func @transform_5(%arg0: i32) -> (i32, i32) {
    %c0_i32 = arith.constant 0 : i32
    %c0_i32_0 = arith.constant 0 : i32
    %c0_i32_1 = arith.constant 0 : i32
    return %c0_i32, %c0_i32_0 : i32, i32
  }
  func.func @transform_6(%arg0: i32) -> (i32, i32) {
    %c0_i32 = arith.constant 0 : i32
    %c0_i32_0 = arith.constant 0 : i32
    %c0_i32_1 = arith.constant 0 : i32
    return %c0_i32, %c0_i32_0 : i32, i32
  }
  func.func @transform_7(%arg0: i32) -> (i32, i32) {
    %c0_i32 = arith.constant 0 : i32
    %c0_i32_0 = arith.constant 0 : i32
    %c0_i32_1 = arith.constant 0 : i32
    return %c0_i32, %c0_i32_0 : i32, i32
  }
  func.func @transform_8(%arg0: i32) -> (i32, i32) {
    %c0_i32 = arith.constant 0 : i32
    %c0_i32_0 = arith.constant 0 : i32
    %c0_i32_1 = arith.constant 0 : i32
    return %c0_i32, %c0_i32_0 : i32, i32
  }
  func.func @transform_9(%arg0: i32) -> (i32, i32) {
    %c0_i32 = arith.constant 0 : i32
    %c0_i32_0 = arith.constant 0 : i32
    return %arg0, %c0_i32 : i32, i32
  }
}

</mosaic_0001>

<bundles_post_ra>
// kernel: tpu_custom_call.1
= control target key start
LH: loop header
LB: loop body
LE: loop exit
PB: predicated region body
PF: predicated region fallthrough
CT: control target
= control target key end

     0   :  { %14 = vsyncpa [#allocation3], 0  ;;  %s1058_s0 = inlined_call_operand.hbm [shape: bf16[16,35], index: 0, kind: input, shape index: {}]   ;;  %s1059_s1 = inlined_call_operand.hbm [shape: bf16[35,128], index: 1, kind: input, shape index: {}]   ;;  %s1060_s2 = inlined_call_operand.vmem [shape: f32[1,128], index: 2, kind: input, shape index: {}]   ;;  %s1061_s3 = inlined_call_operand.hbm [shape: bf16[128,128], index: 3, kind: input, shape index: {}]   ;;  %s1062_s4 = inlined_call_operand.vmem [shape: f32[1,128], index: 4, kind: input, shape index: {}]   ;;  %s1063_s5 = inlined_call_operand.hbm [shape: bf16[128,128], index: 5, kind: input, shape index: {}]   ;;  %s1064_s6 = inlined_call_operand.vmem [shape: f32[1,128], index: 6, kind: input, shape index: {}]   ;;  %s1065_s7 = inlined_call_operand.hbm [shape: bf16[128,128], index: 7, kind: input, shape index: {}]   ;;  %s1066_s8 = inlined_call_operand.vmem [shape: f32[1,128], index: 8, kind: input, shape index: {}]   ;;  %s1067_s9 = inlined_call_operand.vmem [shape: f32[16,8], index: 9, kind: output, shape index: {}]  }
   0x1   :  { %15 = vsyncpa [#allocation5], 0 }
   0x2   :  { %16 = vsyncpa [#allocation8], 0  ;;  %s856_s30 = smov [#allocation4]   ;;  %s857_s11 = smov [#allocation7]  }
   0x3   :  { %s34_s10 = sshll.u32 %s856_s30, 4  ;;  %s62_s12 = sshll.u32 %s857_s11, 4  ;;  %s35_s10 = int_to_ptr.vmem [resolvable:$true] %s34_s10  ;;  %s916_s12 = int_to_ptr.vmem [resolvable:$true] %s62_s12 }
   0x4   :  { %s740_s15 = scalar_lea.hbm %s1059_s1, 320 }
   0x5   :  { %p741_p0 = scmp.ne.s32.totalorder %s1059_s1, %s740_s15  ;;  %p744_p1 = scmp.lt.u32.totalorder %s740_s15, %s1059_s1 }
   0x7   :  { %p746_p2 = pnand %p744_p1, %p741_p0 }
   0x9   :  { %749 = shalt.err (!%p746_p2)
}
   0xa   :  { %s750_s20 = scalar_lea.vmem %s35_s10, 320  ;;  %p755_p4 = scmp.lt.s32.totalorder %s35_s10, %s35_s10 }
   0xb   :  { %p751_p3 = scmp.ne.s32.totalorder %s35_s10, %s750_s20  ;;  %p756_p5 = scmp.lt.s32.totalorder %s750_s20, %s750_s20 }
   0xd   :  { %p757_p6 = por %p756_p5, %p755_p4 }
   0xf   :  { %p758_p7 = pnand %p757_p6, %p751_p3 }
  0x11   :  { %761 = shalt.err (!%p758_p7)
}
  0x12   :  { %s858_s21 = smov 64   ;;  %s859_s22 = smov 4  }
  0x13   :  { %40 = dma.hbm_to_vmem [thread:$0]  %s1059_s1, 320, %s35_s10, [#allocation5], %s858_s21, %s858_s21, %s859_s22  }
  0x14   :  { %s762_s27 = scalar_lea.hbm %s1063_s5, 1024 }
  0x15   :  { %p763_p8 = scmp.ne.s32.totalorder %s1063_s5, %s762_s27  ;;  %p766_p9 = scmp.lt.u32.totalorder %s762_s27, %s1063_s5 }
  0x17   :  { %p768_p10 = pnand %p766_p9, %p763_p8 }
  0x19   :  { %771 = shalt.err (!%p768_p10)
}
  0x1a   :  { %s772_s13 = scalar_lea.vmem %s916_s12, 1024  ;;  %p777_p12 = scmp.lt.s32.totalorder %s916_s12, %s916_s12 }
  0x1b   :  { %p773_p11 = scmp.ne.s32.totalorder %s916_s12, %s772_s13  ;;  %p778_p13 = scmp.lt.s32.totalorder %s772_s13, %s772_s13 }
  0x1d   :  { %p779_p0 = por %p778_p13, %p777_p12 }
  0x1f   :  { %p780_p1 = pnand %p779_p0, %p773_p11 }
  0x21   :  { %783 = shalt.err (!%p780_p1)
}
  0x22   :  { %68 = dma.hbm_to_vmem [thread:$0]  %s1063_s5, 1024, %s916_s12, [#allocation8], %s858_s21, %s858_s21, %s859_s22  }
  0x23   :  { %s860_s14 = smov [#allocation2]   ;;  %s861_s16 = smov [#allocation6]  }
  0x24   :  { %s22_s15 = sshll.u32 %s860_s14, 4  ;;  %s48_s17 = sshll.u32 %s861_s16, 4  ;;  %s23_s15 = int_to_ptr.vmem [resolvable:$true] %s22_s15  ;;  %s953_s17 = int_to_ptr.vmem [resolvable:$true] %s48_s17 }
  0x25   :  { %s784_s20 = scalar_lea.hbm %s1058_s0, 128 }
  0x26   :  { %p785_p2 = scmp.ne.s32.totalorder %s1058_s0, %s784_s20  ;;  %p788_p3 = scmp.lt.u32.totalorder %s784_s20, %s1058_s0 }
  0x28   :  { %p790_p4 = pnand %p788_p3, %p785_p2 }
  0x2a   :  { %793 = shalt.err (!%p790_p4)
}
  0x2b   :  { %s794_s5 = scalar_lea.vmem %s23_s15, 128  ;;  %p799_p6 = scmp.lt.s32.totalorder %s23_s15, %s23_s15 }
  0x2c   :  { %p795_p5 = scmp.ne.s32.totalorder %s23_s15, %s794_s5  ;;  %p800_p7 = scmp.lt.s32.totalorder %s794_s5, %s794_s5 }
  0x2e   :  { %p801_p8 = por %p800_p7, %p799_p6 }
  0x30   :  { %p802_p9 = pnand %p801_p8, %p795_p5 }
  0x32   :  { %805 = shalt.err (!%p802_p9)
}
  0x33   :  { %28 = dma.hbm_to_vmem [thread:$0]  %s1058_s0, 128, %s23_s15, [#allocation3], %s858_s21, %s858_s21, %s859_s22  }
  0x34   :  { %s806_s30 = scalar_lea.hbm %s1061_s3, 1024 }
  0x35   :  { %p807_p10 = scmp.ne.s32.totalorder %s1061_s3, %s806_s30  ;;  %p810_p11 = scmp.lt.u32.totalorder %s806_s30, %s1061_s3 }
  0x37   :  { %p812_p12 = pnand %p810_p11, %p807_p10 }
  0x39   :  { %815 = shalt.err (!%p812_p12)
}
  0x3a   :  { %s816_s14 = scalar_lea.vmem %s953_s17, 1024  ;;  %p821_p0 = scmp.lt.s32.totalorder %s953_s17, %s953_s17 }
  0x3b   :  { %p817_p13 = scmp.ne.s32.totalorder %s953_s17, %s816_s14  ;;  %p822_p1 = scmp.lt.s32.totalorder %s816_s14, %s816_s14 }
  0x3d   :  { %p823_p2 = por %p822_p1, %p821_p0 }
  0x3f   :  { %p824_p3 = pnand %p823_p2, %p817_p13 }
  0x41   :  { %827 = shalt.err (!%p824_p3)
}
  0x42   :  { %54 = dma.hbm_to_vmem [thread:$0]  %s1061_s3, 1024, %s953_s17, [#allocation5], %s858_s21, %s858_s21, %s859_s22  }
  0x43   :  { %s862_s16 = smov [#allocation9]   ;;  %s828_s23 = scalar_lea.hbm %s1065_s7, 1024 }
  0x44   :  { %s76_s18 = sshll.u32 %s862_s16, 4  ;;  %p829_p4 = scmp.ne.s32.totalorder %s1065_s7, %s828_s23  ;;  %s77_s18 = int_to_ptr.vmem [resolvable:$true] %s76_s18 }
  0x45   :  { %p832_p5 = scmp.lt.u32.totalorder %s828_s23, %s1065_s7 }
  0x47   :  { %p834_p6 = pnand %p832_p5, %p829_p4 }
  0x49   :  { %837 = shalt.err (!%p834_p6)
}
  0x4a   :  { %s838_s12 = scalar_lea.vmem %s77_s18, 1024  ;;  %p843_p8 = scmp.lt.s32.totalorder %s77_s18, %s77_s18 }
  0x4b   :  { %p839_p7 = scmp.ne.s32.totalorder %s77_s18, %s838_s12  ;;  %p844_p9 = scmp.lt.s32.totalorder %s838_s12, %s838_s12 }
  0x4d   :  { %p845_p10 = por %p844_p9, %p843_p8 }
  0x4f   :  { %p846_p11 = pnand %p845_p10, %p839_p7 }
  0x51   :  { %849 = shalt.err (!%p846_p11)
}
  0x52   :  { %82 = dma.hbm_to_vmem [thread:$0]  %s1065_s7, 1024, %s77_s18, [#allocation8], %s858_s21, %s858_s21, %s859_s22  }
  0x53   :  { %850 = dma.done.wait [#allocation3], 128  }
  0x54   :  { %851 = vsyncadd [#allocation3], 4294967168 }
  0x55   :  { %852 = dma.done.wait [#allocation5], 1344  }
  0x56   :  { %853 = vsyncadd [#allocation5], 4294965952 }
  0x57   :  { %854 = dma.done.wait [#allocation8], 2048  }
  0x58   :  { %855 = vsyncadd [#allocation8], 4294965248  ;;  %v863_v0 = vmov 0.0   ;;  %vm139_vm0 = vcmask 1040384   ;;  %vm864_vm1 = vmmov 0   ;;  %vm140_vm2 = vcmask 1041408  }
  0x59   :  { %624 = vmatprep.subr.bf16.mxu0 %v863_v0  ;;  %634 = vmatprep.subr.bf16.mxu1 %v863_v0  ;;  %v865_v1 = vmov 65535   ;;  %v704_v3 = vld [vmem:[#allocation4] sm:$0xff]   ;;  %v705_v5 = vld [vmem:[#allocation4 + $0x8] sm:$0xff]   ;;  %v706_v6 = vld [vmem:[#allocation4 + $0x10] ss:$0 sps:$4 sm:$0x33]  }
  0x5a   :  { %630 = vmatprep.mubr.msk.bf16.mxu0 %vm864_vm1, %v863_v0  ;;  %650 = vmatprep.mubr.msk.bf16.mxu1 %vm864_vm1, %v863_v0  ;;  %v141_v2 = vsel %vm139_vm0, 4294967295, %v865_v1  ;;  %v708_v7 = vld [vmem:[#allocation6] sm:$0xff]   ;;  %v709_v9 = vld [vmem:[#allocation6 + $0x8] sm:$0xff]   ;;  %vm135_vm3 = vcmask 285696   ;;  %v710_v11 = vld [vmem:[#allocation6 + $0x10] sm:$0xff]   ;;  %vm550_vm4 = vcmask 64512  }
  0x5b   :  { %v142_v4 = vsel %vm140_vm2, %v141_v2, 0  ;;  %625 = vmatpush3.bf16.msra.mxu0 %v704_v3  ;;  %635 = vmatpush3.bf16.msra.mxu1 %v708_v7  ;;  %v707_v10 = vld [vmem:[#allocation2] sm:$0xff]   ;;  %v711_v12 = vld [vmem:[#allocation6 + $0x18] sm:$0xff]   ;;  %v714_v15 = vld [vmem:[#allocation6 + $0x30] sm:$0xff]  }
  0x5c   :  { %626 = vmatprep.subr.bf16.mxu0 %v863_v0  ;;  %v144_v8 = vand.u32 %v706_v6, %v142_v4  ;;  %636 = vmatprep.subr.bf16.mxu1 %v863_v0  ;;  %v712_v13 = vld [vmem:[#allocation6 + $0x20] sm:$0xff]   ;;  %v713_v14 = vld [vmem:[#allocation6 + $0x28] sm:$0xff]   ;;  %v715_v16 = vld [vmem:[#allocation6 + $0x38] sm:$0xff]  }
  0x5d   :  { %v716_v17 = vld [vmem:[#allocation7] sm:$0xff]   ;;  %v717_v18 = vld [vmem:[#allocation7 + $0x8] sm:$0xff]   ;;  %v718_v19 = vld [vmem:[#allocation7 + $0x10] sm:$0xff]  }
  0x5e   :  { %v719_v20 = vld [vmem:[#allocation7 + $0x18] sm:$0xff]   ;;  %v720_v21 = vld [vmem:[#allocation7 + $0x20] sm:$0xff]   ;;  %v721_v22 = vld [vmem:[#allocation7 + $0x28] sm:$0xff]  }
  0x5f   :  { %627 = vmatpush3.bf16.msra.mxu0 %v705_v5  ;;  %637 = vmatpush3.bf16.msra.mxu1 %v709_v9  ;;  %v560_v23 = vld [vmem:[%s1060_s2] ss:$0 sm:$0xff]  ;;  %v723_v34 = vld [vmem:[#allocation7 + $0x38] sm:$0xff]   ;;  %v724_v35 = vld [vmem:[#allocation9] sm:$0xff]  }
  0x60   :  { %628 = vmatprep.subr.bf16.mxu0 %v863_v0  ;;  %638 = vmatprep.subr.bf16.mxu1 %v863_v0  ;;  %v722_v33 = vld [vmem:[#allocation7 + $0x30] sm:$0xff]   ;;  %v725_v36 = vld [vmem:[#allocation9 + $0x8] sm:$0xff]   ;;  %v727_v38 = vld [vmem:[#allocation9 + $0x18] sm:$0xff]  }
  0x61   :  { %v726_v37 = vld [vmem:[#allocation9 + $0x10] sm:$0xff]   ;;  %v728_v39 = vld [vmem:[#allocation9 + $0x20] sm:$0xff]   ;;  %v729_v40 = vld [vmem:[#allocation9 + $0x28] sm:$0xff]  }
  0x62   :  { %v566_v41 = vld [vmem:[%s1062_s4] ss:$0 sm:$0xff]  ;;  %v731_v52 = vld [vmem:[#allocation9 + $0x38] sm:$0xff]  }
  0x63   :  { %629 = vmatpush3.bf16.msra.mxu0 %v144_v8  ;;  %639 = vmatpush3.bf16.msra.mxu1 %v710_v11  ;;  %v730_v51 = vld [vmem:[#allocation9 + $0x30] sm:$0xff]  }
  0x64   :  { %654 = vmatprep.subr.bf16.mxu0 %v863_v0  ;;  %640 = vmatprep.subr.bf16.mxu1 %v863_v0  ;;  %v575_v53 = vld [vmem:[%s1064_s6] ss:$0 sm:$0xff] }
  0x65   :  { %v584_v63 = vld [vmem:[%s1066_s8] ss:$0 sm:$0xff] }
  0x66   :  { %631 = vmatmul.mubr.msk.bf16.vlgmr.msra.gmra.mrb[0].mxu0 %vm135_vm3, %v707_v10 }
  0x67   :  { %670 = vmatprep.mubr.msk.bf16.mxu0 %vm864_vm1, %v863_v0  ;;  %641 = vmatpush3.bf16.msra.mxu1 %v711_v12 }
  0x68   :  { %642 = vmatprep.subr.bf16.mxu1 %v863_v0  ;;  %655 = vmatpush3.bf16.msra.mxu0 %v716_v17 }
  0x69   :  { %656 = vmatprep.subr.bf16.mxu0 %v863_v0 }
  0x6b   :  { %643 = vmatpush3.bf16.msra.mxu1 %v712_v13 }
  0x6c   :  { %644 = vmatprep.subr.bf16.mxu1 %v863_v0  ;;  %657 = vmatpush3.bf16.msra.mxu0 %v717_v18 }
  0x6d   :  { %658 = vmatprep.subr.bf16.mxu0 %v863_v0 }
  0x6f   :  { %645 = vmatpush3.bf16.msra.mxu1 %v713_v14 }
  0x70   :  { %646 = vmatprep.subr.bf16.mxu1 %v863_v0  ;;  %659 = vmatpush3.bf16.msra.mxu0 %v718_v19 }
  0x71   :  { %660 = vmatprep.subr.bf16.mxu0 %v863_v0 }
  0x73   :  { %647 = vmatpush3.bf16.msra.mxu1 %v714_v15 }
  0x74   :  { %648 = vmatprep.subr.bf16.mxu1 %v863_v0  ;;  %661 = vmatpush3.bf16.msra.mxu0 %v719_v20 }
  0x75   :  { %662 = vmatprep.subr.bf16.mxu0 %v863_v0 }
  0x77   :  { %649 = vmatpush3.bf16.msra.mxu1 %v715_v16 }
  0x78   :  { %674 = vmatprep.subr.bf16.mxu1 %v863_v0  ;;  %663 = vmatpush3.bf16.msra.mxu0 %v720_v21 }
  0x79   :  { %664 = vmatprep.subr.bf16.mxu0 %v863_v0 }
  0x7c   :  { %665 = vmatpush3.bf16.msra.mxu0 %v721_v22 }
  0x7d   :  { %666 = vmatprep.subr.bf16.mxu0 %v863_v0 }
  0x80   :  { %667 = vmatpush3.bf16.msra.mxu0 %v722_v33 }
  0x81   :  { %668 = vmatprep.subr.bf16.mxu0 %v863_v0 }
  0x84   :  { %669 = vmatpush3.bf16.msra.mxu0 %v723_v34 }
 0x139   :  { %v180_v24 = vpop.f32.mrb[0].mxu0 }
 0x13a   :  { %v181_v25 = vadd.f32 %v560_v23, %v180_v24  ;;  %v632_v26 = vpop.f32.mrb[1].mxu0 }
 0x13b   :  { %v183_v27 = vpop.f32.mrb[2].mxu0 }
 0x13c   :  { %v184_v28 = vadd.f32 %v560_v23, %v183_v27  ;;  %v633_v29 = vpop.f32.mrb[3].mxu0  ;;  %v187_v30 = vmax.f32 %v181_v25, 0.0 }
 0x13e   :  { %v188_v31 = vmax.f32 %v184_v28, 0.0 }
 0x140   :  { %v189_v32 = vpack.c.bf16 %v188_v31, %v187_v30 }
 0x142   :  { %651 = vmatmul.mubr.bf16.vlgmr.msra.gmra.mrb[0].mxu1 %v189_v32 }
 0x143   :  { %690 = vmatprep.mubr.msk.bf16.mxu1 %vm864_vm1, %v863_v0  ;;  %675 = vmatpush3.bf16.msra.mxu1 %v724_v35 }
 0x144   :  { %676 = vmatprep.subr.bf16.mxu1 %v863_v0 }
 0x147   :  { %677 = vmatpush3.bf16.msra.mxu1 %v725_v36 }
 0x148   :  { %678 = vmatprep.subr.bf16.mxu1 %v863_v0 }
 0x14b   :  { %679 = vmatpush3.bf16.msra.mxu1 %v726_v37 }
 0x14c   :  { %680 = vmatprep.subr.bf16.mxu1 %v863_v0 }
 0x14f   :  { %681 = vmatpush3.bf16.msra.mxu1 %v727_v38 }
 0x150   :  { %682 = vmatprep.subr.bf16.mxu1 %v863_v0 }
 0x153   :  { %683 = vmatpush3.bf16.msra.mxu1 %v728_v39 }
 0x154   :  { %684 = vmatprep.subr.bf16.mxu1 %v863_v0 }
 0x157   :  { %685 = vmatpush3.bf16.msra.mxu1 %v729_v40 }
 0x158   :  { %686 = vmatprep.subr.bf16.mxu1 %v863_v0 }
 0x15b   :  { %687 = vmatpush3.bf16.msra.mxu1 %v730_v51 }
 0x15c   :  { %688 = vmatprep.subr.bf16.mxu1 %v863_v0 }
 0x15f   :  { %689 = vmatpush3.bf16.msra.mxu1 %v731_v52 }
 0x215   :  { %v295_v42 = vpop.f32.mrb[0].mxu1 }
 0x216   :  { %v296_v43 = vadd.f32 %v566_v41, %v295_v42  ;;  %v652_v44 = vpop.f32.mrb[1].mxu1 }
 0x217   :  { %v298_v45 = vpop.f32.mrb[2].mxu1 }
 0x218   :  { %v299_v46 = vadd.f32 %v566_v41, %v298_v45  ;;  %v653_v47 = vpop.f32.mrb[3].mxu1  ;;  %v302_v48 = vmax.f32 %v296_v43, 0.0 }
 0x21a   :  { %v303_v49 = vmax.f32 %v299_v46, 0.0 }
 0x21c   :  { %v304_v50 = vpack.c.bf16 %v303_v49, %v302_v48 }
 0x21e   :  { %671 = vmatmul.mubr.bf16.vlgmr.msra.gmra.mrb[4].mxu0 %v304_v50 }
 0x2f1   :  { %v410_v54 = vpop.f32.mrb[4].mxu0 }
 0x2f2   :  { %v411_v55 = vadd.f32 %v575_v53, %v410_v54  ;;  %v672_v56 = vpop.f32.mrb[5].mxu0 }
 0x2f3   :  { %v413_v57 = vpop.f32.mrb[6].mxu0 }
 0x2f4   :  { %v414_v58 = vadd.f32 %v575_v53, %v413_v57  ;;  %v673_v59 = vpop.f32.mrb[7].mxu0  ;;  %v417_v60 = vmax.f32 %v411_v55, 0.0 }
 0x2f6   :  { %v418_v61 = vmax.f32 %v414_v58, 0.0 }
 0x2f8   :  { %v419_v62 = vpack.c.bf16 %v418_v61, %v417_v60 }
 0x2fa   :  { %691 = vmatmul.mubr.bf16.vlgmr.msra.gmra.mrb[4].mxu1 %v419_v62 }
 0x3cd   :  { %v525_v0 = vpop.f32.mrb[4].mxu1 }
 0x3ce   :  { %v526_v1 = vadd.f32 %v584_v63, %v525_v0  ;;  %v692_v2 = vpop.f32.mrb[5].mxu1 }
 0x3cf   :  { %v528_v3 = vpop.f32.mrb[6].mxu1 }
 0x3d0   :  { %532 = vmax.xlane.f32.xlu0 %v526_v1  ;;  %v693_v4 = vpop.f32.mrb[7].mxu1  ;;  %v529_v5 = vadd.f32 %v584_v63, %v528_v3 }
 0x3d4   :  { %534 = vmax.xlane.f32.xlu0 %v529_v5 }
 0x45d   :  { %v533_v6 = vpop.xlane.xlu0 %532 }
 0x45e   :  { %v536_v7 = vsub.f32 %v526_v1, %v533_v6 }
 0x460   :  { %v538_v8 = vmul.f32 1.442695, %v536_v7 }
 0x461   :  { %v535_v9 = vpop.xlane.xlu0 %534 }
 0x462   :  { %732 = vpow2.f32 %v538_v8  ;;  %v537_v10 = vsub.f32 %v529_v5, %v535_v9 }
 0x464   :  { %v540_v11 = vmul.f32 1.442695, %v537_v10 }
 0x466   :  { %734 = vpow2.f32 %v540_v11 }
 0x46c   :  { %v733_v12 = vpop.eup %732 }
 0x46d   :  { %542 = vadd.xlane.f32.xlu1 %v733_v12 }
 0x470   :  { %v735_v13 = vpop.eup %734 }
 0x471   :  { %544 = vadd.xlane.f32.xlu1 %v735_v13 }
 0x4fa   :  { %v543_v14 = vpop.xlane.xlu1 %542 }
 0x4fb   :  { %736 = vrcp.f32 %v543_v14 }
 0x4fe   :  { %v545_v15 = vpop.xlane.xlu1 %544 }
 0x4ff   :  { %738 = vrcp.f32 %v545_v15 }
 0x505   :  { %v737_v16 = vpop.eup %736 }
 0x506   :  { %v547_v17 = vmul.f32 %v737_v16, %v733_v12 }
 0x508   :  { %551 = vst.msk [vmem:[%s1067_s9] sm:$0xff] %vm550_vm4, %v547_v17 }
 0x509   :  { %v739_v18 = vpop.eup %738 }
 0x50a   :  { %v549_v19 = vmul.f32 %v739_v18, %v735_v13 }
 0x50c   :  { %552 = vst.msk [vmem:[%s1067_s9 + $0x8] sm:$0xff] %vm550_vm4, %v549_v19 }
 0x50d   :  { %557 = vsyncpa [#allocation3], 1 }
 0x50e   :  { %558 = vsyncpa [#allocation5], 1 }
 0x50f   :  { %559 = vsyncpa [#allocation8], 1 }

</bundles_post_ra>
